<compile_context>
chip_gen: v7x
topology: tpu7x:2x2x1
jax: 0.10.0
libtpu: 0.0.40
codegen_flags: <defaults>
</compile_context>

<pallas_src>
import functools
import math

import jax
import jax.numpy as jnp
from jax.experimental import pallas as pl
from jax.experimental.pallas import tpu as pltpu


def _self_output_kernel(x_ref, res_ref, w_ref, b_ref, g_ref, beta_ref, out_ref,
                        *, eps):
    # x_ref/res_ref/out_ref: (tile_rows, D); w_ref: (D, D); others: (1, D)
    x = x_ref[...].astype(jnp.float32)

    # dense: y = x @ W + b   (W is stored as (in, out), i.e. torch weight.T)
    y = jnp.dot(x, w_ref[...], preferred_element_type=jnp.float32)
    y = y + b_ref[...]

    # dropout -> identity (eval mode); residual add
    z = y + res_ref[...].astype(jnp.float32)

    # LayerNorm over the last dim
    mean = jnp.mean(z, axis=-1, keepdims=True)
    c = z - mean
    var = jnp.mean(c * c, axis=-1, keepdims=True)
    inv = jax.lax.rsqrt(var + eps)
    out = c * inv * g_ref[...] + beta_ref[...]

    out_ref[...] = out.astype(out_ref.dtype)


def _round_up(x, m):
    return (x + m - 1) // m * m


def bert_sim_self_output(hidden_states, input_tensor, fea_shape,
                         weight, bias, gamma, beta,
                         *, eps=1e-12, block_rows=256):
    """Fused dense + residual + LayerNorm.

    hidden_states: (b*seq, m, dim)
    input_tensor:  any shape with b*seq*m*dim elements (viewed as (b*seq, m, dim))
    weight:        (dim, dim)  applied as x @ weight   (== torch Linear weight.T)
    bias, gamma, beta: (dim,)
    Returns (b*seq, m, dim) float32.
    """
    b, m, seq, dim = fea_shape
    N = b * seq * m
    D = dim

    x = hidden_states.reshape(N, D).astype(jnp.float32)
    res = input_tensor.reshape(N, D).astype(jnp.float32)

    # Row tile: multiple of 8 (sublane constraint); last dim is always the full D.
    tn = min(block_rows, _round_up(N, 8))
    n_pad = _round_up(N, tn)
    if n_pad != N:
        pad = n_pad - N
        x = jnp.pad(x, ((0, pad), (0, 0)))
        res = jnp.pad(res, ((0, pad), (0, 0)))

    grid = (n_pad // tn,)

    bias2 = bias.reshape(1, D).astype(jnp.float32)
    gamma2 = gamma.reshape(1, D).astype(jnp.float32)
    beta2 = beta.reshape(1, D).astype(jnp.float32)
    w = weight.astype(jnp.float32)

    kernel = functools.partial(_self_output_kernel, eps=float(eps))

    cost = pl.CostEstimate(
        flops=2 * n_pad * D * D + 10 * n_pad * D,
        transcendentals=0,
        bytes_accessed=(3 * n_pad * D + D * D + 3 * D) * 4,
    )

    out = pl.pallas_call(
        kernel,
        out_shape=jax.ShapeDtypeStruct((n_pad, D), jnp.float32),
        grid_spec=pltpu.PrefetchScalarGridSpec(
            num_scalar_prefetch=0,
            grid=grid,
            in_specs=[
                pl.BlockSpec((tn, D), lambda i: (i, 0)),   # x rows (tiled)
                pl.BlockSpec((tn, D), lambda i: (i, 0)),   # residual rows (tiled)
                pl.BlockSpec((D, D), lambda i: (0, 0)),    # weight (resident)
                pl.BlockSpec((1, D), lambda i: (0, 0)),    # bias (resident)
                pl.BlockSpec((1, D), lambda i: (0, 0)),    # gamma (resident)
                pl.BlockSpec((1, D), lambda i: (0, 0)),    # beta (resident)
            ],
            out_specs=pl.BlockSpec((tn, D), lambda i: (i, 0)),
        ),
        compiler_params=pltpu.CompilerParams(
            dimension_semantics=("parallel",),
        ),
        cost_estimate=cost,
    )(x, res, w, bias2, gamma2, beta2)

    return out[:N].reshape(b * seq, m, D)


def _reference(hidden_states, input_tensor, fea_shape, weight, bias, gamma, beta, eps):
    b, m, seq, dim = fea_shape
    res = input_tensor.reshape(b * seq, m, dim)
    y = hidden_states @ weight + bias
    z = y + res
    mean = z.mean(-1, keepdims=True)
    var = ((z - mean) ** 2).mean(-1, keepdims=True)
    return (z - mean) / jnp.sqrt(var + eps) * gamma + beta


if __name__ == "__main__":
    # Small shapes consistent with the module's forward.
    b, m, seq, hidden = 2, 4, 8, 32
    eps = 1e-12
    fea_shape = (b, m, seq, hidden)

    key = jax.random.PRNGKey(0)
    k_h, k_in, k_w, k_b, k_g, k_beta = jax.random.split(key, 6)

    hidden_states = jax.random.normal(k_h, (b * seq, m, hidden), dtype=jnp.float32)
    input_tensor = jax.random.normal(k_in, (b * seq, m, hidden), dtype=jnp.float32)

    # Deterministic Linear init (kaiming-uniform-style bound, like torch defaults).
    bound = 1.0 / math.sqrt(hidden)
    weight = jax.random.uniform(k_w, (hidden, hidden), jnp.float32, -bound, bound)
    bias = jax.random.uniform(k_b, (hidden,), jnp.float32, -bound, bound)
    gamma = 1.0 + 0.1 * jax.random.normal(k_g, (hidden,), dtype=jnp.float32)
    beta = 0.1 * jax.random.normal(k_beta, (hidden,), dtype=jnp.float32)

    out = bert_sim_self_output(
        hidden_states, input_tensor, fea_shape, weight, bias, gamma, beta, eps=eps
    )
    out = jax.block_until_ready(out)

    ref = _reference(hidden_states, input_tensor, fea_shape,
                     weight, bias, gamma, beta, eps)
    assert out.shape == (b * seq, m, hidden)
    assert jnp.allclose(out, ref, atol=1e-4, rtol=1e-4), float(jnp.abs(out - ref).max())

    print("KERNEL_OK")
</pallas_src>

<mosaic_0001>
module attributes {stable_mosaic.version = 11 : i64} {
  func.func @_self_output_kernel(%arg0: i32, %arg1: memref<64x32xf32, #tpu.memory_space<vmem>>, %arg2: memref<64x32xf32, #tpu.memory_space<vmem>>, %arg3: memref<32x32xf32, #tpu.memory_space<vmem>>, %arg4: memref<1x32xf32, #tpu.memory_space<vmem>>, %arg5: memref<1x32xf32, #tpu.memory_space<vmem>>, %arg6: memref<1x32xf32, #tpu.memory_space<vmem>>, %arg7: memref<64x32xf32, #tpu.memory_space<vmem>>) attributes {dimension_semantics = [#tpu.dimension_semantics<parallel>], iteration_bounds = array<i64: 1>, scalar_prefetch = 0 : i64, scratch_operands = 0 : i64, tpu.core_type = #tpu.core_type<tc>, window_params = [{transform_indices = @transform_0, window_bounds = array<i64: 64, 32>}, {transform_indices = @transform_1, window_bounds = array<i64: 64, 32>}, {pipeline_mode = #tpu.pipeline_mode<synchronous>, transform_indices = @transform_2, window_bounds = array<i64: 32, 32>}, {pipeline_mode = #tpu.pipeline_mode<synchronous>, transform_indices = @transform_3, window_bounds = array<i64: 1, 32>}, {pipeline_mode = #tpu.pipeline_mode<synchronous>, transform_indices = @transform_4, window_bounds = array<i64: 1, 32>}, {pipeline_mode = #tpu.pipeline_mode<synchronous>, transform_indices = @transform_5, window_bounds = array<i64: 1, 32>}, {transform_indices = @transform_6, window_bounds = array<i64: 64, 32>}]} {
    %c0 = arith.constant 0 : index
    %c0_0 = arith.constant 0 : index
    %0 = vector.load %arg1[%c0, %c0_0] : memref<64x32xf32, #tpu.memory_space<vmem>>, vector<64x32xf32>
    %c0_1 = arith.constant 0 : index
    %c0_2 = arith.constant 0 : index
    %1 = vector.load %arg3[%c0_1, %c0_2] : memref<32x32xf32, #tpu.memory_space<vmem>>, vector<32x32xf32>
    %cst = arith.constant dense<0.000000e+00> : vector<64x32xf32>
    %2 = tpu.matmul %0, %1, %cst {dimension_numbers = #tpu.dot_dimension_numbers<[1], [0], [0], [1], [0, 0, 1, 1], [], []>} : vector<64x32xf32>, vector<32x32xf32>, vector<64x32xf32> -> vector<64x32xf32>
    %c0_3 = arith.constant 0 : index
    %c0_4 = arith.constant 0 : index
    %3 = vector.load %arg4[%c0_3, %c0_4] : memref<1x32xf32, #tpu.memory_space<vmem>>, vector<1x32xf32>
    %4 = vector.broadcast %3 : vector<1x32xf32> to vector<64x32xf32>
    %5 = arith.addf %2, %4 : vector<64x32xf32>
    %c0_5 = arith.constant 0 : index
    %c0_6 = arith.constant 0 : index
    %6 = vector.load %arg2[%c0_5, %c0_6] : memref<64x32xf32, #tpu.memory_space<vmem>>, vector<64x32xf32>
    %7 = arith.addf %5, %6 : vector<64x32xf32>
    %cst_7 = arith.constant dense<0.000000e+00> : vector<64xf32>
    %8 = vector.multi_reduction <add>, %7, %cst_7 [1] : vector<64x32xf32> to vector<64xf32>
    %9 = vector.shape_cast %8 : vector<64xf32> to vector<64x1xf32>
    %cst_8 = arith.constant 3.200000e+01 : f32
    %10 = vector.broadcast %cst_8 : f32 to vector<64x1xf32>
    %11 = arith.divf %9, %10 : vector<64x1xf32>
    %12 = vector.broadcast %11 : vector<64x1xf32> to vector<64x32xf32>
    %13 = arith.subf %7, %12 : vector<64x32xf32>
    %14 = arith.mulf %13, %13 : vector<64x32xf32>
    %cst_9 = arith.constant dense<0.000000e+00> : vector<64xf32>
    %15 = vector.multi_reduction <add>, %14, %cst_9 [1] : vector<64x32xf32> to vector<64xf32>
    %16 = vector.shape_cast %15 : vector<64xf32> to vector<64x1xf32>
    %cst_10 = arith.constant 3.200000e+01 : f32
    %17 = vector.broadcast %cst_10 : f32 to vector<64x1xf32>
    %18 = arith.divf %16, %17 : vector<64x1xf32>
    %cst_11 = arith.constant 9.99999996E-13 : f32
    %19 = vector.broadcast %cst_11 : f32 to vector<64x1xf32>
    %20 = arith.addf %18, %19 : vector<64x1xf32>
    %21 = math.rsqrt %20 : vector<64x1xf32>
    %22 = vector.broadcast %21 : vector<64x1xf32> to vector<64x32xf32>
    %23 = arith.mulf %13, %22 : vector<64x32xf32>
    %c0_12 = arith.constant 0 : index
    %c0_13 = arith.constant 0 : index
    %24 = vector.load %arg5[%c0_12, %c0_13] : memref<1x32xf32, #tpu.memory_space<vmem>>, vector<1x32xf32>
    %25 = vector.broadcast %24 : vector<1x32xf32> to vector<64x32xf32>
    %26 = arith.mulf %23, %25 : vector<64x32xf32>
    %c0_14 = arith.constant 0 : index
    %c0_15 = arith.constant 0 : index
    %27 = vector.load %arg6[%c0_14, %c0_15] : memref<1x32xf32, #tpu.memory_space<vmem>>, vector<1x32xf32>
    %28 = vector.broadcast %27 : vector<1x32xf32> to vector<64x32xf32>
    %29 = arith.addf %26, %28 : vector<64x32xf32>
    %c0_16 = arith.constant 0 : index
    %c0_17 = arith.constant 0 : index
    %30 = vector.load %arg7[%c0_16, %c0_17] : memref<64x32xf32, #tpu.memory_space<vmem>>, vector<64x32xf32>
    tpu.vector_store %arg7[%c0_16, %c0_17], %29 {strides = array<i32>} : memref<64x32xf32, #tpu.memory_space<vmem>>, vector<64x32xf32>,
    return
  }
  func.func @transform_0(%arg0: i32) -> (i32, i32) {
    %c0_i32 = arith.constant 0 : i32
    %c0_i32_0 = arith.constant 0 : i32
    return %arg0, %c0_i32 : i32, i32
  }
  func.func @transform_1(%arg0: i32) -> (i32, i32) {
    %c0_i32 = arith.constant 0 : i32
    %c0_i32_0 = arith.constant 0 : i32
    return %arg0, %c0_i32 : i32, i32
  }
  func.func @transform_2(%arg0: i32) -> (i32, i32) {
    %c0_i32 = arith.constant 0 : i32
    %c0_i32_0 = arith.constant 0 : i32
    %c0_i32_1 = arith.constant 0 : i32
    return %c0_i32, %c0_i32_0 : i32, i32
  }
  func.func @transform_3(%arg0: i32) -> (i32, i32) {
    %c0_i32 = arith.constant 0 : i32
    %c0_i32_0 = arith.constant 0 : i32
    %c0_i32_1 = arith.constant 0 : i32
    return %c0_i32, %c0_i32_0 : i32, i32
  }
  func.func @transform_4(%arg0: i32) -> (i32, i32) {
    %c0_i32 = arith.constant 0 : i32
    %c0_i32_0 = arith.constant 0 : i32
    %c0_i32_1 = arith.constant 0 : i32
    return %c0_i32, %c0_i32_0 : i32, i32
  }
  func.func @transform_5(%arg0: i32) -> (i32, i32) {
    %c0_i32 = arith.constant 0 : i32
    %c0_i32_0 = arith.constant 0 : i32
    %c0_i32_1 = arith.constant 0 : i32
    return %c0_i32, %c0_i32_0 : i32, i32
  }
  func.func @transform_6(%arg0: i32) -> (i32, i32) {
    %c0_i32 = arith.constant 0 : i32
    %c0_i32_0 = arith.constant 0 : i32
    return %arg0, %c0_i32 : i32, i32
  }
}

</mosaic_0001>

<bundles_post_ra>
// kernel: tpu_custom_call.1
= control target key start
LH: loop header
LB: loop body
LE: loop exit
PB: predicated region body
PF: predicated region fallthrough
CT: control target
= control target key end

     0   :  { %vm42_vm0 = vcmask 261120   ;;  %s606_s2 = inlined_call_operand.vmem [shape: f32[32,32], index: 2, kind: input, shape index: {}]   ;;  %s607_s0 = inlined_call_operand.vmem [shape: f32[64,32], index: 0, kind: input, shape index: {}]   ;;  %s608_s3 = inlined_call_operand.vmem [shape: f32[1,32], index: 3, kind: input, shape index: {}]   ;;  %s609_s1 = inlined_call_operand.vmem [shape: f32[64,32], index: 1, kind: input, shape index: {}]   ;;  %s610_s4 = inlined_call_operand.vmem [shape: f32[1,32], index: 4, kind: input, shape index: {}]   ;;  %s611_s5 = inlined_call_operand.vmem [shape: f32[1,32], index: 5, kind: input, shape index: {}]   ;;  %s612_s6 = inlined_call_operand.vmem [shape: f32[64,32], index: 6, kind: output, shape index: {}]  }
   0x1   :  { %v31_v0 = vld [vmem:[%s606_s2] sm:$0xff]  ;;  %v32_v1 = vld [vmem:[%s606_s2 + $0x8] sm:$0xff]  ;;  %v33_v2 = vld [vmem:[%s606_s2 + $0x10] sm:$0xff] }
   0x2   :  { %v378_v3 = vpack.c.bf16 %v32_v1, %v31_v0  ;;  %v34_v4 = vld [vmem:[%s606_s2 + $0x18] sm:$0xff]  ;;  %v23_v5 = vld [vmem:[%s607_s0] sm:$0xff]  ;;  %v24_v8 = vld [vmem:[%s607_s0 + $0x8] sm:$0xff] }
   0x3   :  { %v27_v6 = vld [vmem:[%s607_s0 + $0x20] sm:$0xff]  ;;  %v382_v7 = vpack.c.bf16 %v34_v4, %v33_v2  ;;  %366 = vmatprep.mubr.msk.f32.mxu0 %vm42_vm0, %v23_v5  ;;  %v28_v9 = vld [vmem:[%s607_s0 + $0x28] sm:$0xff]  ;;  %v25_v10 = vld [vmem:[%s607_s0 + $0x10] sm:$0xff] }
   0x4   :  { %372 = vmatprep.mubr.msk.f32.mxu1 %vm42_vm0, %v27_v6  ;;  %379 = vmatprep.subr.bf16.mxu0 %v378_v3  ;;  %v29_v11 = vld [vmem:[%s607_s0 + $0x30] sm:$0xff]  ;;  %v26_v12 = vld [vmem:[%s607_s0 + $0x18] sm:$0xff]  ;;  %v335_v14 = vld [vmem:[%s608_s3] ss:$0 sm:$0xff] }
   0x5   :  { %386 = vmatprep.subr.bf16.mxu1 %v378_v3  ;;  %381 = vmatpush3.bf16.msra.mxu0 %v378_v3  ;;  %v30_v13 = vld [vmem:[%s607_s0 + $0x38] sm:$0xff]  ;;  %v177_v17 = vld [vmem:[%s609_s1 + $0x28] sm:$0xff]  ;;  %v172_v24 = vld [vmem:[%s609_s1] sm:$0xff] }
   0x6   :  { %388 = vmatpush3.bf16.msra.mxu1 %v378_v3  ;;  %383 = vmatprep.subr.bf16.mxu0 %v382_v7  ;;  %v173_v18 = vld [vmem:[%s609_s1 + $0x8] sm:$0xff]  ;;  %v175_v29 = vld [vmem:[%s609_s1 + $0x18] sm:$0xff]  ;;  %v174_v37 = vld [vmem:[%s609_s1 + $0x10] sm:$0xff] }
   0x7   :  { %387 = vmatprep.subr.bf16.mxu1 %v382_v7  ;;  %v176_v39 = vld [vmem:[%s609_s1 + $0x20] sm:$0xff]  ;;  %v179_v44 = vld [vmem:[%s609_s1 + $0x38] sm:$0xff]  ;;  %v178_v45 = vld [vmem:[%s609_s1 + $0x30] sm:$0xff] }
   0x9   :  { %385 = vmatpush3.bf16.msra.mxu0 %v382_v7 }
   0xa   :  { %389 = vmatpush3.bf16.msra.mxu1 %v382_v7 }
   0xc   :  { %367 = vmatmul.mubr.msk.f32.vlgmr.msra.gmra.mrb[0].mxu0 %vm42_vm0, %v24_v8 }
   0xd   :  { %373 = vmatmul.mubr.msk.f32.vlgmr.msra.gmra.mrb[0].mxu1 %vm42_vm0, %v28_v9  ;;  %369 = vmatprep.mubr.msk.f32.mxu0 %vm42_vm0, %v25_v10 }
   0xe   :  { %375 = vmatprep.mubr.msk.f32.mxu1 %vm42_vm0, %v29_v11 }
  0x10   :  { %370 = vmatmul.mubr.msk.f32.gmra.mrb[2].mxu0 %vm42_vm0, %v26_v12 }
  0x11   :  { %376 = vmatmul.mubr.msk.f32.gmra.mrb[2].mxu1 %vm42_vm0, %v30_v13 }
  0xdf   :  { %v368_v15 = vpop.f32.mrb[0].mxu0 }
  0xe0   :  { %v374_v16 = vpop.f32.mrb[0].mxu1  ;;  %v139_v19 = vadd.f32 %v368_v15, %v335_v14  ;;  %v133_v21 = vpop.f32.mrb[1].mxu0 }
  0xe1   :  { %v159_v20 = vadd.f32 %v374_v16, %v335_v14  ;;  %v153_v22 = vpop.f32.mrb[1].mxu1  ;;  %v134_v23 = vadd.f32 %v335_v14, %v133_v21 }
  0xe2   :  { %v181_v26 = vadd.f32 %v173_v18, %v139_v19  ;;  %v154_v28 = vadd.f32 %v335_v14, %v153_v22 }
  0xe3   :  { %v185_v25 = vadd.f32 %v177_v17, %v159_v20  ;;  %v371_v27 = vpop.f32.mrb[2].mxu0  ;;  %v180_v35 = vadd.f32 %v172_v24, %v134_v23 }
  0xe4   :  { %v377_v30 = vpop.f32.mrb[2].mxu1  ;;  %v149_v31 = vadd.f32 %v371_v27, %v335_v14  ;;  %v191_v33 = vsel %vm42_vm0, %v181_v26, 0.0  ;;  %v143_v34 = vpop.f32.mrb[3].mxu0  ;;  %v184_v48 = vadd.f32 %v176_v39, %v154_v28 }
  0xe5   :  { %v203_v32 = vsel %vm42_vm0, %v185_v25, 0.0  ;;  %v163_v36 = vpop.f32.mrb[3].mxu1  ;;  %192 = vadd.xlane.f32.xlu0 %v191_v33  ;;  %v144_v38 = vadd.f32 %v335_v14, %v143_v34  ;;  %v169_v41 = vadd.f32 %v377_v30, %v335_v14  ;;  %v188_v47 = vsel %vm42_vm0, %v180_v35, 0.0 }
  0xe6   :  { %204 = vadd.xlane.f32.xlu1 %v203_v32  ;;  %v183_v40 = vadd.f32 %v175_v29, %v149_v31  ;;  %v164_v42 = vadd.f32 %v335_v14, %v163_v36  ;;  %v200_v52 = vsel %vm42_vm0, %v184_v48, 0.0 }
  0xe7   :  { %v182_v43 = vadd.f32 %v174_v37, %v144_v38  ;;  %v187_v50 = vadd.f32 %v179_v44, %v169_v41 }
  0xe8   :  { %v197_v46 = vsel %vm42_vm0, %v183_v40, 0.0  ;;  %v186_v51 = vadd.f32 %v178_v45, %v164_v42 }
  0xe9   :  { %189 = vadd.xlane.f32.xlu0 %v188_v47  ;;  %v194_v49 = vsel %vm42_vm0, %v182_v43, 0.0  ;;  %v209_v53 = vsel %vm42_vm0, %v187_v50, 0.0 }
  0xea   :  { %198 = vadd.xlane.f32.xlu1 %v197_v46  ;;  %v206_v54 = vsel %vm42_vm0, %v186_v51, 0.0 }
  0xed   :  { %201 = vadd.xlane.f32.xlu0 %v200_v52 }
  0xee   :  { %195 = vadd.xlane.f32.xlu1 %v194_v49 }
  0xf1   :  { %207 = vadd.xlane.f32.xlu0 %v206_v54 }
  0xf2   :  { %210 = vadd.xlane.f32.xlu1 %v209_v53 }
 0x172   :  { %v193_v56 = vpop.xlane.xlu0 %192 }
 0x173   :  { %v205_v55 = vpop.xlane.xlu1 %204  ;;  %v214_v58 = vmul.f32 0.03125, %v193_v56  ;;  %v345_v56 = vld [vmem:[%s611_s5] ss:$0 sm:$0xff] }
 0x174   :  { %v218_v57 = vmul.f32 0.03125, %v205_v55 }
 0x175   :  { %v522_v60 = vsub.f32 %v181_v26, %v214_v58 }
 0x176   :  { %v520_v59 = vsub.f32 %v185_v25, %v218_v57  ;;  %v190_v62 = vpop.xlane.xlu0 %189 }
 0x177   :  { %v199_v61 = vpop.xlane.xlu1 %198  ;;  %v213_v0 = vmul.f32 0.03125, %v190_v62  ;;  %v230_v1 = vmul.f32 %v522_v60, %v522_v60 }
 0x178   :  { %v216_v63 = vmul.f32 0.03125, %v199_v61  ;;  %v234_v5 = vmul.f32 %v520_v59, %v520_v59 }
 0x179   :  { %v528_v3 = vsub.f32 %v180_v35, %v213_v0  ;;  %v240_v4 = vsel %vm42_vm0, %v230_v1, 0.0 }
 0x17a   :  { %v526_v2 = vsub.f32 %v183_v40, %v216_v63  ;;  %241 = vadd.xlane.f32.xlu1 %v240_v4  ;;  %v202_v7 = vpop.xlane.xlu0 %201  ;;  %v252_v14 = vsel %vm42_vm0, %v234_v5, 0.0 }
 0x17b   :  { %v196_v6 = vpop.xlane.xlu1 %195  ;;  %v217_v9 = vmul.f32 0.03125, %v202_v7  ;;  %v229_v10 = vmul.f32 %v528_v3, %v528_v3 }
 0x17c   :  { %v215_v8 = vmul.f32 0.03125, %v196_v6  ;;  %v232_v11 = vmul.f32 %v526_v2, %v526_v2 }
 0x17d   :  { %v539_v13 = vsub.f32 %v184_v48, %v217_v9  ;;  %v237_v15 = vsel %vm42_vm0, %v229_v10, 0.0 }
 0x17e   :  { %v537_v12 = vsub.f32 %v182_v43, %v215_v8  ;;  %253 = vadd.xlane.f32.xlu1 %v252_v14  ;;  %238 = vadd.xlane.f32.xlu0 %v237_v15  ;;  %v208_v17 = vpop.xlane.xlu0 %207  ;;  %v246_v21 = vsel %vm42_vm0, %v232_v11, 0.0 }
 0x17f   :  { %v211_v16 = vpop.xlane.xlu1 %210  ;;  %v219_v19 = vmul.f32 0.03125, %v208_v17  ;;  %v233_v20 = vmul.f32 %v539_v13, %v539_v13 }
 0x180   :  { %v220_v18 = vmul.f32 0.03125, %v211_v16  ;;  %v231_v25 = vmul.f32 %v537_v12, %v537_v12 }
 0x181   :  { %v548_v23 = vsub.f32 %v186_v51, %v219_v19  ;;  %v249_v24 = vsel %vm42_vm0, %v233_v20, 0.0  ;;  %v344_v51 = vld [vmem:[%s610_s4] ss:$0 sm:$0xff] }
 0x182   :  { %v546_v22 = vsub.f32 %v187_v50, %v220_v18  ;;  %247 = vadd.xlane.f32.xlu1 %v246_v21  ;;  %250 = vadd.xlane.f32.xlu0 %v249_v24  ;;  %v243_v28 = vsel %vm42_vm0, %v231_v25, 0.0 }
 0x183   :  { %v235_v29 = vmul.f32 %v548_v23, %v548_v23 }
 0x184   :  { %v236_v26 = vmul.f32 %v546_v22, %v546_v22 }
 0x185   :  { %v255_v30 = vsel %vm42_vm0, %v235_v29, 0.0 }
 0x186   :  { %v258_v27 = vsel %vm42_vm0, %v236_v26, 0.0  ;;  %244 = vadd.xlane.f32.xlu0 %v243_v28 }
 0x187   :  { %259 = vadd.xlane.f32.xlu1 %v258_v27 }
 0x18a   :  { %256 = vadd.xlane.f32.xlu0 %v255_v30 }
 0x207   :  { %v242_v31 = vpop.xlane.xlu1 %241 }
 0x208   :  { %v262_v32 = vmul.f32 0.03125, %v242_v31 }
 0x20a   :  { %v270_v33 = vadd.f32 1e-12, %v262_v32 }
 0x20b   :  { %v254_v34 = vpop.xlane.xlu1 %253  ;;  %v239_v35 = vpop.xlane.xlu0 %238 }
 0x20c   :  { %390 = vrsqrt.f32 %v270_v33  ;;  %v266_v36 = vmul.f32 0.03125, %v254_v34  ;;  %v261_v37 = vmul.f32 0.03125, %v239_v35 }
 0x20e   :  { %v274_v38 = vadd.f32 1e-12, %v266_v36  ;;  %v269_v39 = vadd.f32 1e-12, %v261_v37 }
 0x20f   :  { %v248_v40 = vpop.xlane.xlu1 %247  ;;  %v251_v41 = vpop.xlane.xlu0 %250 }
 0x210   :  { %392 = vrsqrt.f32 %v274_v38  ;;  %v264_v42 = vmul.f32 0.03125, %v248_v40  ;;  %v265_v43 = vmul.f32 0.03125, %v251_v41 }
 0x211   :  { %394 = vrsqrt.f32 %v269_v39 }
 0x212   :  { %v272_v44 = vadd.f32 1e-12, %v264_v42  ;;  %v273_v45 = vadd.f32 1e-12, %v265_v43 }
 0x213   :  { %v245_v47 = vpop.xlane.xlu0 %244 }
 0x214   :  { %v260_v46 = vpop.xlane.xlu1 %259  ;;  %396 = vrsqrt.f32 %v272_v44  ;;  %v263_v49 = vmul.f32 0.03125, %v245_v47 }
 0x215   :  { %v268_v48 = vmul.f32 0.03125, %v260_v46  ;;  %398 = vrsqrt.f32 %v273_v45 }
 0x216   :  { %v391_v50 = vpop.eup %390  ;;  %v271_v53 = vadd.f32 1e-12, %v263_v49 }
 0x217   :  { %v276_v52 = vadd.f32 1e-12, %v268_v48  ;;  %v286_v54 = vmul.f32 %v391_v50, %v522_v60  ;;  %v257_v55 = vpop.xlane.xlu0 %256 }
 0x218   :  { %v267_v57 = vmul.f32 0.03125, %v257_v55 }
 0x219   :  { %400 = vrsqrt.f32 %v276_v52  ;;  %v301_v58 = vmul.f32 %v344_v51, %v286_v54 }
 0x21a   :  { %402 = vrsqrt.f32 %v271_v53  ;;  %v393_v61 = vpop.eup %392  ;;  %v275_v62 = vadd.f32 1e-12, %v267_v57 }
 0x21b   :  { %v395_v63 = vpop.eup %394  ;;  %v316_v0 = vadd.f32 %v345_v56, %v301_v58  ;;  %v290_v1 = vmul.f32 %v393_v61, %v520_v59 }
 0x21c   :  { %v285_v4 = vmul.f32 %v395_v63, %v528_v3  ;;  %404 = vrsqrt.f32 %v275_v62 }
 0x21d   :  { %324 = vst.msk [vmem:[%s612_s6 + $0x8] sm:$0xff] %vm42_vm0, %v316_v0  ;;  %v305_v60 = vmul.f32 %v344_v51, %v290_v1 }
 0x21e   :  { %v397_v5 = vpop.eup %396  ;;  %v300_v6 = vmul.f32 %v344_v51, %v285_v4 }
 0x21f   :  { %v399_v7 = vpop.eup %398  ;;  %v320_v8 = vadd.f32 %v345_v56, %v305_v60  ;;  %v288_v9 = vmul.f32 %v397_v5, %v526_v2 }
 0x220   :  { %v315_v10 = vadd.f32 %v345_v56, %v300_v6  ;;  %v289_v11 = vmul.f32 %v399_v7, %v539_v13 }
 0x221   :  { %328 = vst.msk [vmem:[%s612_s6 + $0x28] sm:$0xff] %vm42_vm0, %v320_v8  ;;  %v303_v59 = vmul.f32 %v344_v51, %v288_v9 }
 0x222   :  { %323 = vst.msk [vmem:[%s612_s6] sm:$0xff] %vm42_vm0, %v315_v10  ;;  %v304_v14 = vmul.f32 %v344_v51, %v289_v11 }
 0x223   :  { %v401_v3 = vpop.eup %400  ;;  %v318_v16 = vadd.f32 %v345_v56, %v303_v59 }
 0x224   :  { %v403_v15 = vpop.eup %402  ;;  %v292_v2 = vmul.f32 %v401_v3, %v546_v22  ;;  %v319_v17 = vadd.f32 %v345_v56, %v304_v14 }
 0x225   :  { %v287_v13 = vmul.f32 %v403_v15, %v537_v12  ;;  %326 = vst.msk [vmem:[%s612_s6 + $0x18] sm:$0xff] %vm42_vm0, %v318_v16 }
 0x226   :  { %v307_v18 = vmul.f32 %v344_v51, %v292_v2  ;;  %v405_v19 = vpop.eup %404  ;;  %327 = vst.msk [vmem:[%s612_s6 + $0x20] sm:$0xff] %vm42_vm0, %v319_v17 }
 0x227   :  { %v302_v20 = vmul.f32 %v344_v51, %v287_v13  ;;  %v291_v24 = vmul.f32 %v405_v19, %v548_v23 }
 0x228   :  { %v322_v21 = vadd.f32 %v345_v56, %v307_v18 }
 0x229   :  { %v317_v22 = vadd.f32 %v345_v56, %v302_v20  ;;  %v306_v12 = vmul.f32 %v344_v51, %v291_v24 }
 0x22a   :  { %330 = vst.msk [vmem:[%s612_s6 + $0x38] sm:$0xff] %vm42_vm0, %v322_v21 }
 0x22b   :  { %325 = vst.msk [vmem:[%s612_s6 + $0x10] sm:$0xff] %vm42_vm0, %v317_v22  ;;  %v321_v25 = vadd.f32 %v345_v56, %v306_v12 }
 0x22d   :  { %329 = vst.msk [vmem:[%s612_s6 + $0x30] sm:$0xff] %vm42_vm0, %v321_v25 }

</bundles_post_ra>
